<compile_context>
chip_gen: v6e
topology: v6e:2x2x1
jax: 0.10.0
libtpu: 0.0.40
codegen_flags: <defaults>
</compile_context>

<pallas_src>
import functools

import jax
import jax.numpy as jnp
from jax import lax
from jax.experimental import pallas as pl
from jax.experimental.pallas import tpu as pltpu

BN_EPS = 1e-5
NEG_SLOPE = 0.2


def _round_up(x, m):
    return (x + m - 1) // m * m


def _vmem_limit_bytes():
    """Per-generation scoped-VMEM limit (v7x: 64 MiB phys, v5e/v6e: 128 MiB)."""
    try:
        cap = int(pltpu.get_tpu_info().vmem_capacity_bytes)
    except Exception:  # fall back to a v7x-safe limit
        cap = 64 << 20
    return min(cap * 3 // 4, 64 << 20)


# ---------------------------------------------------------------------------
# Phase 1: tiled conv-as-matmul + per-tile BN statistics (one pass over y)
# ---------------------------------------------------------------------------
def _matmul_stats_kernel(num_k, m_rows, tile_m, p_ref, w_ref, y_ref, sum_ref,
                         ssq_ref, *acc):
    def finalize(y_f32):
        # Store y (bf16 by default); stats always in f32 from the accumulator.
        y_ref[...] = y_f32.astype(y_ref.dtype)
        # Mask rows past the true M (last partial tile) out of the BN stats.
        row = lax.broadcasted_iota(jnp.int32, (tile_m, 1), 0)
        row = row + pl.program_id(0) * tile_m
        ym = jnp.where(row < m_rows, y_f32, 0.0)
        sum_ref[...] = jnp.sum(ym, axis=0, keepdims=True)[None]
        ssq_ref[...] = jnp.sum(ym * ym, axis=0, keepdims=True)[None]

    if num_k == 1:
        # Single contraction step: no accumulator scratch, no epilogue copy.
        finalize(jnp.dot(p_ref[...], w_ref[...],
                         preferred_element_type=jnp.float32))
    else:
        acc_ref = acc[0]
        k = pl.program_id(1)

        @pl.when(k == 0)
        def _():
            acc_ref[...] = jnp.zeros_like(acc_ref)

        acc_ref[...] += jnp.dot(p_ref[...], w_ref[...],
                                preferred_element_type=jnp.float32)

        @pl.when(k == num_k - 1)
        def _():
            finalize(acc_ref[...])


# ---------------------------------------------------------------------------
# Phase 2: per-channel affine + LeakyReLU(0.2), writing NCHW tiles directly
# ---------------------------------------------------------------------------
def _affine_act_nchw_kernel(activation, cout, y_ref, scale_ref, shift_ref,
                            o_ref):
    z = y_ref[...].astype(jnp.float32) * scale_ref[...] + shift_ref[...]
    if activation:
        z = jnp.where(z >= 0, z, NEG_SLOPE * z)
    zt = jnp.transpose(z)                       # (cpad, tile_hw) via XLU
    o_ref[...] = zt[:cout, :][None].astype(o_ref.dtype)


def _affine_act_flat_kernel(activation, y_ref, scale_ref, shift_ref, o_ref):
    z = y_ref[...].astype(jnp.float32) * scale_ref[...] + shift_ref[...]
    if activation:
        z = jnp.where(z >= 0, z, NEG_SLOPE * z)
    o_ref[...] = z.astype(o_ref.dtype)


# ---------------------------------------------------------------------------
# Host-side im2col (single concat pass, already in the matmul dtype, K-padded)
# ---------------------------------------------------------------------------
def _im2col(x_nhwc, kernel, stride, padding, kpad):
    n, h, w, c = x_nhwc.shape
    ho = (h + 2 * padding - kernel) // stride + 1
    wo = (w + 2 * padding - kernel) // stride + 1
    xp = jnp.pad(x_nhwc,
                 ((0, 0), (padding, padding), (padding, padding), (0, 0)))
    cols = []
    for kh in range(kernel):
        for kw in range(kernel):
            cols.append(xp[:, kh:kh + stride * ho:stride,
                           kw:kw + stride * wo:stride, :])
    kdim = kernel * kernel * c
    if kpad > kdim:
        cols.append(jnp.zeros((n, ho, wo, kpad - kdim), x_nhwc.dtype))
    patches = jnp.concatenate(cols, axis=-1)
    return patches.reshape(n * ho * wo, kpad), ho, wo


def _choose_tile_hw(hw, cpad, cout, y_bytes, budget):
    """Spatial tile for the NCHW-writing phase-2 kernel (None -> flat path)."""
    if hw % 8 != 0:
        return None
    per_row = 2 * cpad * y_bytes + 2 * cout * 4 + 2 * cpad * 4
    cap = min(max(budget // per_row, 8), 8192)
    best = None
    d = 128
    while d <= min(hw, cap):
        if hw % d == 0:
            best = d
        d += 128
    if best is not None:
        return best
    if hw <= max(cap, 1024):
        return hw        # whole-image row block; out last dim == full dim
    return None


@functools.partial(
    jax.jit,
    static_argnames=("kernel", "stride", "padding", "activation", "batchnorm",
                     "matmul_dtype"))
def downsample_conv(x_nchw, weight, bias, gamma, beta, *, kernel=4, stride=2,
                    padding=1, activation=True, batchnorm=True,
                    matmul_dtype=jnp.bfloat16):
    """PyTorch DownSampleConv forward. x: [N,Cin,H,W]; weight: [Cout,Cin,K,K]."""
    n, cin, h, w = x_nchw.shape
    cout = weight.shape[0]
    kdim = kernel * kernel * cin

    in_bytes = jnp.dtype(matmul_dtype).itemsize
    y_dtype = matmul_dtype            # bf16 intermediate by default; f32 path stays f32
    y_bytes = jnp.dtype(y_dtype).itemsize

    # Contraction tiling: 256-aligned for v6e/v7x's 2x256^2 MXU; tiny kdim
    # stays at 128 to avoid blowing up the patch array with zero columns.
    if kdim <= 128:
        tile_k = 128
    else:
        tile_k = min(_round_up(kdim, 256), 512)
    kpad = _round_up(kdim, tile_k)
    num_k = kpad // tile_k

    cpad = _round_up(cout, 256) if cout > 128 else _round_up(cout, 128)

    # Build patches (cast to the matmul dtype *before* the 4x blowup).
    x_nhwc = jnp.transpose(x_nchw, (0, 2, 3, 1)).astype(matmul_dtype)
    patches, ho, wo = _im2col(x_nhwc, kernel, stride, padding, kpad)
    m = n * ho * wo

    vmem_limit = _vmem_limit_bytes()
    budget = min(vmem_limit // 2, 32 << 20)

    # Phase-1 M tiling: as big as the VMEM budget allows (amortizes weight
    # re-streaming + per-step overhead), but keep >= 2 M steps so both of
    # v7x's TensorCores get work on the "parallel" axis.
    per_row = 2 * tile_k * in_bytes + 2 * cpad * y_bytes
    if num_k > 1:
        per_row += cpad * 4                       # f32 accumulator scratch
    fixed = 2 * tile_k * cpad * in_bytes          # double-buffered weight tile
    tile_m = max((budget - fixed) // max(per_row, 1), 8)
    tile_m = max(min(tile_m // 8 * 8, 4096), 8)
    tile_m = min(tile_m, max(_round_up(-(-m // 2), 8), 8))
    num_m = -(-m // tile_m)

    # PyTorch weight [Cout,Cin,kh,kw] -> [kh,kw,Cin,Cout] -> [Kdim, Cout], padded.
    w_mat = jnp.transpose(weight, (2, 3, 1, 0)).reshape(kdim, cout)
    w_mat = jnp.pad(w_mat.astype(matmul_dtype),
                    ((0, kpad - kdim), (0, cpad - cout)))

    kernel1 = functools.partial(_matmul_stats_kernel, num_k, m, tile_m)
    scratch = [pltpu.VMEM((tile_m, cpad), jnp.float32)] if num_k > 1 else []

    y_flat, part_sum, part_ssq = pl.pallas_call(
        kernel1,
        out_shape=(
            jax.ShapeDtypeStruct((m, cpad), y_dtype),
            jax.ShapeDtypeStruct((num_m, 1, cpad), jnp.float32),
            jax.ShapeDtypeStruct((num_m, 1, cpad), jnp.float32),
        ),
        grid=(num_m, num_k),
        in_specs=[
            pl.BlockSpec((tile_m, tile_k), lambda i, k: (i, k)),
            pl.BlockSpec((tile_k, cpad), lambda i, k: (k, 0)),
        ],
        out_specs=(
            pl.BlockSpec((tile_m, cpad), lambda i, k: (i, 0)),
            pl.BlockSpec((1, 1, cpad), lambda i, k: (i, 0, 0)),
            pl.BlockSpec((1, 1, cpad), lambda i, k: (i, 0, 0)),
        ),
        scratch_shapes=scratch,
        compiler_params=pltpu.CompilerParams(
            dimension_semantics=("parallel", "arbitrary"),
            vmem_limit_bytes=vmem_limit),
    )(patches, w_mat)

    # Tiny per-channel host-side math on [Cout]-sized vectors.
    if batchnorm:
        # Conv bias is dropped: it cancels exactly against the BN mean subtraction.
        tot_sum = jnp.sum(part_sum[:, 0, :cout], axis=0)
        tot_ssq = jnp.sum(part_ssq[:, 0, :cout], axis=0)
        mean = tot_sum / m
        # TODO(synk): E[y^2]-E[y]^2 in f32 can cancel for very large M; switch
        # to a shifted accumulation if that regime ever matters.
        var = jnp.maximum(tot_ssq / m - mean * mean, 0.0)
        inv = lax.rsqrt(var + BN_EPS)
        scale = gamma.astype(jnp.float32) * inv
        shift = beta.astype(jnp.float32) - mean * scale
    else:
        scale = jnp.ones((cout,), jnp.float32)
        shift = bias.astype(jnp.float32)

    scale_row = jnp.pad(scale, (0, cpad - cout)).reshape(1, cpad)
    shift_row = jnp.pad(shift, (0, cpad - cout)).reshape(1, cpad)

    hw = ho * wo
    tile_hw = _choose_tile_hw(hw, cpad, cout, y_bytes, budget)

    if tile_hw is not None:
        # NCHW-writing phase 2: affine + LeakyReLU + in-kernel XLU transpose,
        # lane-dense (spatial-major) stores, no extra XLA transpose pass.
        steps = hw // tile_hw
        out3 = pl.pallas_call(
            functools.partial(_affine_act_nchw_kernel, activation, cout),
            out_shape=jax.ShapeDtypeStruct((n, cout, hw), jnp.float32),
            grid=(n, steps),
            in_specs=[
                pl.BlockSpec((tile_hw, cpad), lambda b, t: (b * steps + t, 0)),
                pl.BlockSpec((1, cpad), lambda b, t: (0, 0)),
                pl.BlockSpec((1, cpad), lambda b, t: (0, 0)),
            ],
            out_specs=pl.BlockSpec((1, cout, tile_hw), lambda b, t: (b, 0, t)),
            compiler_params=pltpu.CompilerParams(
                dimension_semantics=("parallel", "parallel"),
                vmem_limit_bytes=vmem_limit),
        )(y_flat, scale_row, shift_row)
        return out3.reshape(n, cout, ho, wo)

    # Fallback (odd spatial sizes): flat elementwise kernel + host transpose.
    out_flat = pl.pallas_call(
        functools.partial(_affine_act_flat_kernel, activation),
        out_shape=jax.ShapeDtypeStruct((m, cpad), jnp.float32),
        grid=(num_m,),
        in_specs=[
            pl.BlockSpec((tile_m, cpad), lambda i: (i, 0)),
            pl.BlockSpec((1, cpad), lambda i: (0, 0)),
            pl.BlockSpec((1, cpad), lambda i: (0, 0)),
        ],
        out_specs=pl.BlockSpec((tile_m, cpad), lambda i: (i, 0)),
        compiler_params=pltpu.CompilerParams(
            dimension_semantics=("parallel",),
            vmem_limit_bytes=vmem_limit),
    )(y_flat, scale_row, shift_row)
    out = out_flat[:, :cout].reshape(n, ho, wo, cout)
    return jnp.transpose(out, (0, 3, 1, 2))


def _reference(x_nchw, weight, bias, gamma, beta, kernel=4, stride=2, padding=1,
               activation=True, batchnorm=True):
    y = lax.conv_general_dilated(
        x_nchw.astype(jnp.float32), weight.astype(jnp.float32),
        window_strides=(stride, stride),
        padding=[(padding, padding), (padding, padding)],
        dimension_numbers=("NCHW", "OIHW", "NCHW"),
    ) + bias.reshape(1, -1, 1, 1)
    if batchnorm:
        mean = jnp.mean(y, axis=(0, 2, 3), keepdims=True)
        var = jnp.mean((y - mean) ** 2, axis=(0, 2, 3), keepdims=True)
        y = (y - mean) * lax.rsqrt(var + BN_EPS)
        y = y * gamma.reshape(1, -1, 1, 1) + beta.reshape(1, -1, 1, 1)
    if activation:
        y = jnp.where(y >= 0, y, NEG_SLOPE * y)
    return y


if __name__ == "__main__":
    key = jax.random.PRNGKey(0)
    k_x, k_w, k_b, k_g, k_be = jax.random.split(key, 5)

    N, C_IN, H, W = 2, 4, 16, 16
    C_OUT, K = 8, 4

    x = jax.random.normal(k_x, (N, C_IN, H, W), dtype=jnp.float32)

    # Deterministic synthetic parameters (PyTorch Conv2d / BatchNorm2d shapes).
    fan_in = C_IN * K * K
    bound = 1.0 / (fan_in ** 0.5)
    weight = jax.random.uniform(k_w, (C_OUT, C_IN, K, K), jnp.float32, -bound, bound)
    bias = jax.random.uniform(k_b, (C_OUT,), jnp.float32, -bound, bound)
    gamma = 1.0 + 0.1 * jax.random.normal(k_g, (C_OUT,), dtype=jnp.float32)
    beta = 0.1 * jax.random.normal(k_be, (C_OUT,), dtype=jnp.float32)

    ref = _reference(x, weight, bias, gamma, beta)

    # Default path: bf16 MXU matmul + bf16 y storage, f32 BN statistics.
    out = jax.block_until_ready(downsample_conv(x, weight, bias, gamma, beta))
    assert out.shape == (N, C_OUT, H // 2, W // 2), out.shape
    err = float(jnp.max(jnp.abs(out - ref)))
    assert err < 5e-2, err

    # Full-f32 path: tight parity with the PyTorch forward semantics.
    out_f32 = jax.block_until_ready(
        downsample_conv(x, weight, bias, gamma, beta,
                        matmul_dtype=jnp.float32))
    err_f32 = float(jnp.max(jnp.abs(out_f32 - ref)))
    assert err_f32 < 1e-4, err_f32

    # No-batchnorm path exercises conv-bias folding into the phase-2 shift.
    ref_nobn = _reference(x, weight, bias, gamma, beta, batchnorm=False)
    out_nobn = jax.block_until_ready(
        downsample_conv(x, weight, bias, gamma, beta, batchnorm=False))
    err_nobn = float(jnp.max(jnp.abs(out_nobn - ref_nobn)))
    assert err_nobn < 5e-2, err_nobn

    print("KERNEL_OK")
</pallas_src>

<mosaic_0001>
module attributes {stable_mosaic.version = 11 : i64} {
  func.func @_matmul_stats_kernel(%arg0: i32, %arg1: i32, %arg2: memref<64x128xbf16, #tpu.memory_space<vmem>>, %arg3: memref<128x128xbf16, #tpu.memory_space<vmem>>, %arg4: memref<64x128xbf16, #tpu.memory_space<vmem>>, %arg5: memref<1x1x128xf32, #tpu.memory_space<vmem>>, %arg6: memref<1x1x128xf32, #tpu.memory_space<vmem>>) attributes {dimension_semantics = [#tpu.dimension_semantics<parallel>, #tpu.dimension_semantics<arbitrary>], iteration_bounds = array<i64: 2, 1>, scalar_prefetch = 0 : i64, scratch_operands = 0 : i64, tpu.core_type = #tpu.core_type<tc>, window_params = [{transform_indices = @transform_0, window_bounds = array<i64: 64, 128>}, {transform_indices = @transform_1, window_bounds = array<i64: 128, 128>}, {transform_indices = @transform_2, window_bounds = array<i64: 64, 128>}, {transform_indices = @transform_3, window_bounds = array<i64: 1, 1, 128>}, {transform_indices = @transform_4, window_bounds = array<i64: 1, 1, 128>}]} {
    %c0 = arith.constant 0 : index
    %c0_0 = arith.constant 0 : index
    %0 = vector.load %arg2[%c0, %c0_0] : memref<64x128xbf16, #tpu.memory_space<vmem>>, vector<64x128xbf16>
    %c0_1 = arith.constant 0 : index
    %c0_2 = arith.constant 0 : index
    %1 = vector.load %arg3[%c0_1, %c0_2] : memref<128x128xbf16, #tpu.memory_space<vmem>>, vector<128x128xbf16>
    %cst = arith.constant dense<0.000000e+00> : vector<64x128xf32>
    %2 = tpu.matmul %0, %1, %cst {dimension_numbers = #tpu.dot_dimension_numbers<[1], [0], [0], [1], [0, 0, 1, 1], [], []>} : vector<64x128xbf16>, vector<128x128xbf16>, vector<64x128xf32> -> vector<64x128xf32>
    %3 = arith.truncf %2 : vector<64x128xf32> to vector<64x128xbf16>
    %c0_3 = arith.constant 0 : index
    %c0_4 = arith.constant 0 : index
    %4 = vector.load %arg4[%c0_3, %c0_4] : memref<64x128xbf16, #tpu.memory_space<vmem>>, vector<64x128xbf16>
    tpu.vector_store %arg4[%c0_3, %c0_4], %3 {strides = array<i32>} : memref<64x128xbf16, #tpu.memory_space<vmem>>, vector<64x128xbf16>,
    %5 = tpu.iota {dimensions = array<i32: 0>} : vector<64x1xi32>
    %c64_i32 = arith.constant 64 : i32
    %6 = arith.muli %arg0, %c64_i32 : i32
    %7 = vector.broadcast %6 : i32 to vector<64x1xi32>
    %8 = arith.addi %5, %7 : vector<64x1xi32>
    %c128_i32 = arith.constant 128 : i32
    %9 = vector.broadcast %c128_i32 : i32 to vector<64x1xi32>
    %10 = arith.cmpi slt, %8, %9 : vector<64x1xi32>
    %cst_5 = arith.constant 0.000000e+00 : f32
    %11 = vector.shape_cast %10 : vector<64x1xi1> to vector<64x1xi1>
    %12 = vector.broadcast %11 : vector<64x1xi1> to vector<64x128xi1>
    %13 = vector.broadcast %cst_5 : f32 to vector<64x128xf32>
    %14 = arith.select %12, %2, %13 : vector<64x128xi1>, vector<64x128xf32>
    %cst_6 = arith.constant dense<0.000000e+00> : vector<128xf32>
    %15 = vector.multi_reduction <add>, %14, %cst_6 [0] : vector<64x128xf32> to vector<128xf32>
    %16 = vector.shape_cast %15 : vector<128xf32> to vector<1x128xf32>
    %17 = vector.shape_cast %16 : vector<1x128xf32> to vector<1x1x128xf32>
    %c0_7 = arith.constant 0 : index
    %c0_8 = arith.constant 0 : index
    %c0_9 = arith.constant 0 : index
    %18 = vector.load %arg5[%c0_7, %c0_8, %c0_9] : memref<1x1x128xf32, #tpu.memory_space<vmem>>, vector<1x1x128xf32>
    tpu.vector_store %arg5[%c0_7, %c0_8, %c0_9], %17 {strides = array<i32>} : memref<1x1x128xf32, #tpu.memory_space<vmem>>, vector<1x1x128xf32>,
    %19 = arith.mulf %14, %14 : vector<64x128xf32>
    %cst_10 = arith.constant dense<0.000000e+00> : vector<128xf32>
    %20 = vector.multi_reduction <add>, %19, %cst_10 [0] : vector<64x128xf32> to vector<128xf32>
    %21 = vector.shape_cast %20 : vector<128xf32> to vector<1x128xf32>
    %22 = vector.shape_cast %21 : vector<1x128xf32> to vector<1x1x128xf32>
    %c0_11 = arith.constant 0 : index
    %c0_12 = arith.constant 0 : index
    %c0_13 = arith.constant 0 : index
    %23 = vector.load %arg6[%c0_11, %c0_12, %c0_13] : memref<1x1x128xf32, #tpu.memory_space<vmem>>, vector<1x1x128xf32>
    tpu.vector_store %arg6[%c0_11, %c0_12, %c0_13], %22 {strides = array<i32>} : memref<1x1x128xf32, #tpu.memory_space<vmem>>, vector<1x1x128xf32>,
    return
  }
  func.func @transform_0(%arg0: i32, %arg1: i32) -> (i32, i32) {
    %c0_i32 = arith.constant 0 : i32
    return %arg0, %arg1 : i32, i32
  }
  func.func @transform_1(%arg0: i32, %arg1: i32) -> (i32, i32) {
    %c0_i32 = arith.constant 0 : i32
    %c0_i32_0 = arith.constant 0 : i32
    return %arg1, %c0_i32 : i32, i32
  }
  func.func @transform_2(%arg0: i32, %arg1: i32) -> (i32, i32) {
    %c0_i32 = arith.constant 0 : i32
    %c0_i32_0 = arith.constant 0 : i32
    return %arg0, %c0_i32 : i32, i32
  }
  func.func @transform_3(%arg0: i32, %arg1: i32) -> (i32, i32, i32) {
    %c0_i32 = arith.constant 0 : i32
    %c0_i32_0 = arith.constant 0 : i32
    %c0_i32_1 = arith.constant 0 : i32
    return %arg0, %c0_i32, %c0_i32_0 : i32, i32, i32
  }
  func.func @transform_4(%arg0: i32, %arg1: i32) -> (i32, i32, i32) {
    %c0_i32 = arith.constant 0 : i32
    %c0_i32_0 = arith.constant 0 : i32
    %c0_i32_1 = arith.constant 0 : i32
    return %arg0, %c0_i32, %c0_i32_0 : i32, i32, i32
  }
}

module attributes {stable_mosaic.version = 11 : i64} {
  func.func @_affine_act_nchw_kernel(%arg0: i32, %arg1: i32, %arg2: memref<64x128xbf16, #tpu.memory_space<vmem>>, %arg3: memref<1x128xf32, #tpu.memory_space<vmem>>, %arg4: memref<1x128xf32, #tpu.memory_space<vmem>>, %arg5: memref<1x8x64xf32, #tpu.memory_space<vmem>>) attributes {dimension_semantics = [#tpu.dimension_semantics<parallel>, #tpu.dimension_semantics<parallel>], iteration_bounds = array<i64: 2, 1>, scalar_prefetch = 0 : i64, scratch_operands = 0 : i64, tpu.core_type = #tpu.core_type<tc>, window_params = [{transform_indices = @transform_0, window_bounds = array<i64: 64, 128>}, {pipeline_mode = #tpu.pipeline_mode<synchronous>, transform_indices = @transform_1, window_bounds = array<i64: 1, 128>}, {pipeline_mode = #tpu.pipeline_mode<synchronous>, transform_indices = @transform_2, window_bounds = array<i64: 1, 128>}, {transform_indices = @transform_3, window_bounds = array<i64: 1, 8, 64>}]} {
    %c0 = arith.constant 0 : index
    %c0_0 = arith.constant 0 : index
    %0 = vector.load %arg2[%c0, %c0_0] : memref<64x128xbf16, #tpu.memory_space<vmem>>, vector<64x128xbf16>
    %1 = arith.extf %0 : vector<64x128xbf16> to vector<64x128xf32>
    %c0_1 = arith.constant 0 : index
    %c0_2 = arith.constant 0 : index
    %2 = vector.load %arg3[%c0_1, %c0_2] : memref<1x128xf32, #tpu.memory_space<vmem>>, vector<1x128xf32>
    %3 = vector.broadcast %2 : vector<1x128xf32> to vector<64x128xf32>
    %4 = arith.mulf %1, %3 : vector<64x128xf32>
    %c0_3 = arith.constant 0 : index
    %c0_4 = arith.constant 0 : index
    %5 = vector.load %arg4[%c0_3, %c0_4] : memref<1x128xf32, #tpu.memory_space<vmem>>, vector<1x128xf32>
    %6 = vector.broadcast %5 : vector<1x128xf32> to vector<64x128xf32>
    %7 = arith.addf %4, %6 : vector<64x128xf32>
    %cst = arith.constant 0.000000e+00 : f32
    %8 = vector.broadcast %cst : f32 to vector<64x128xf32>
    %9 = arith.cmpf oge, %7, %8 : vector<64x128xf32>
    %cst_5 = arith.constant 2.000000e-01 : f32
    %10 = vector.broadcast %cst_5 : f32 to vector<64x128xf32>
    %11 = arith.mulf %10, %7 : vector<64x128xf32>
    %12 = arith.select %9, %7, %11 : vector<64x128xi1>, vector<64x128xf32>
    %13 = tpu.transpose %12, [1, 0] : vector<64x128xf32> -> vector<128x64xf32>
    %14 = vector.extract_strided_slice %13 {offsets = [0, 0], sizes = [8, 64], strides = [1, 1]} : vector<128x64xf32> to vector<8x64xf32>
    %15 = vector.shape_cast %14 : vector<8x64xf32> to vector<1x8x64xf32>
    %c0_6 = arith.constant 0 : index
    %c0_7 = arith.constant 0 : index
    %c0_8 = arith.constant 0 : index
    %16 = vector.load %arg5[%c0_6, %c0_7, %c0_8] : memref<1x8x64xf32, #tpu.memory_space<vmem>>, vector<1x8x64xf32>
    tpu.vector_store %arg5[%c0_6, %c0_7, %c0_8], %15 {strides = array<i32>} : memref<1x8x64xf32, #tpu.memory_space<vmem>>, vector<1x8x64xf32>,
    return
  }
  func.func @transform_0(%arg0: i32, %arg1: i32) -> (i32, i32) {
    %c1_i32 = arith.constant 1 : i32
    %0 = arith.muli %arg0, %c1_i32 : i32
    %1 = arith.addi %0, %arg1 : i32
    %c0_i32 = arith.constant 0 : i32
    %c0_i32_0 = arith.constant 0 : i32
    return %1, %c0_i32 : i32, i32
  }
  func.func @transform_1(%arg0: i32, %arg1: i32) -> (i32, i32) {
    %c0_i32 = arith.constant 0 : i32
    %c0_i32_0 = arith.constant 0 : i32
    %c0_i32_1 = arith.constant 0 : i32
    return %c0_i32, %c0_i32_0 : i32, i32
  }
  func.func @transform_2(%arg0: i32, %arg1: i32) -> (i32, i32) {
    %c0_i32 = arith.constant 0 : i32
    %c0_i32_0 = arith.constant 0 : i32
    %c0_i32_1 = arith.constant 0 : i32
    return %c0_i32, %c0_i32_0 : i32, i32
  }
  func.func @transform_3(%arg0: i32, %arg1: i32) -> (i32, i32, i32) {
    %c0_i32 = arith.constant 0 : i32
    %c0_i32_0 = arith.constant 0 : i32
    return %arg0, %c0_i32, %arg1 : i32, i32, i32
  }
}

</mosaic_0001>

<bundles_post_ra>
// kernel: downsample_conv.3
= control target key start
LH: loop header
LB: loop body
LE: loop exit
PB: predicated region body
PF: predicated region fallthrough
CT: control target
= control target key end

     0   :  { %s473_s12 = smov 0   ;;  %s475_s13 = smov 0   ;;  %s517_s0 = inlined_call_operand.vmem [shape: bf16[128,128], index: 0, kind: input, shape index: {}]   ;;  %s518_s1 = inlined_call_operand.vmem [shape: f32[1,128], index: 1, kind: input, shape index: {}]   ;;  %s519_s2 = inlined_call_operand.vmem [shape: f32[1,128], index: 2, kind: input, shape index: {}]   ;;  %s520_s3 = inlined_call_operand.vmem [shape: f32[2,8,64], index: 3, kind: output, shape index: {}]  }
   0x1   :  { %s477_s14 = smov 0  }
   0x2 LB: > { %s25_s15 = sadd.s32 1, %s447_s13  ;;  %p377_p0 = scmp.ge.s32.totalorder %s451_s14, 1  ;;  %s451_s14 = sphi %s477_s14, %s13_s14   ;;  %s447_s13 = sphi %s475_s13, %s522_s13   ;;  %s443_s12 = sphi %s473_s12, %s521_s12  }
   0x3   : > { %p27_p1 = scmp.ge.s32.totalorder %s25_s15, 2  ;;  %p156_p2 = scmp.lt.s32.totalorder %s451_s14, 3 }
   0x5   : > { %s524_s15 = smov (%p27_p1, %s25_s15), 0  ;;  %p157_p3 = pnand %p377_p0, %p156_p2 }
   0x6   : > { %s378_s16 = sshll.u32 (!%p157_p3), %s443_s12, 3  ;;  %p191_p5 = scmp.lt.s32.totalorder (!%p157_p3), %s443_s12, 1 }
   0x7   : > { %160 = sbr.rel (%p157_p3) target bundleno = 151 (0x97), region = 32  ;;  %p185_p4 = scmp.lt.s32.totalorder (!%p157_p3), %s378_s16, 15 }
   0xc   : > { %s526_s16 = smov (!%p185_p4, %s378_s16), 15  ;;  %v381_v1 = vld [vmem:[%s518_s1] ss:$0 sm:$0xff]  ;;  %s528_s12 = smov (!%p191_p5, %s443_s12), 1  ;;  %vm300_vm8 = vcmask 523264  }
   0xd   : > { %s379_s17 = sshll.u32 %s526_s16, 2  ;;  %v382_v6 = vld [vmem:[%s519_s2] ss:$0 sm:$0xff]  ;;  %s380_s25 = sshll.u32 %s528_s12, 3 }
   0xe   : > { %s188_s20 = scalar_lea.vmem %s517_s0, %s379_s17  ;;  %s197_s28 = scalar_lea.vmem %s520_s3, %s380_s25 }
   0xf   : > { %v386_v0 = vld [vmem:[%s188_s20] sm:$0xff]   ;;  %v401_v2 = vld [vmem:[%s188_s20 + $0x8] sm:$0xff]   ;;  %v402_v11 = vld [vmem:[%s188_s20 + $0x10] sm:$0xff]  }
  0x10   : > { %v387_v3 = vunpack.c.l.bf16 %v386_v0  ;;  %v388_v4 = vunpack.c.h.bf16 %v386_v0  ;;  %v391_v5 = vunpack.c.l.bf16 %v401_v2  ;;  %v392_v7 = vunpack.c.h.bf16 %v401_v2  ;;  %v403_v25 = vld [vmem:[%s188_s20 + $0x18] sm:$0xff]  }
  0x11   : > { %v395_v15 = vunpack.c.l.bf16 %v402_v11  ;;  %v396_v20 = vunpack.c.h.bf16 %v402_v11  ;;  %v399_v26 = vunpack.c.l.bf16 %v403_v25  ;;  %v400_v31 = vunpack.c.h.bf16 %v403_v25 }
  0x12   : > { %v221_v8 = vmul.f32 %v387_v3, %v381_v1  ;;  %v222_v9 = vmul.f32 %v388_v4, %v381_v1  ;;  %v223_v10 = vmul.f32 %v391_v5, %v381_v1  ;;  %v224_v14 = vmul.f32 %v392_v7, %v381_v1 }
  0x13   : > { %v225_v24 = vmul.f32 %v395_v15, %v381_v1  ;;  %v226_v30 = vmul.f32 %v396_v20, %v381_v1  ;;  %v227_v35 = vmul.f32 %v399_v26, %v381_v1  ;;  %v228_v39 = vmul.f32 %v400_v31, %v381_v1 }
  0x14   : > { %v236_v12 = vadd.f32 %v382_v6, %v221_v8  ;;  %v237_v13 = vadd.f32 %v382_v6, %v222_v9  ;;  %v238_v18 = vadd.f32 %v382_v6, %v223_v10  ;;  %v239_v23 = vadd.f32 %v382_v6, %v224_v14 }
  0x15   : > { %v240_v29 = vadd.f32 %v382_v6, %v225_v24  ;;  %v241_v34 = vadd.f32 %v382_v6, %v226_v30  ;;  %v242_v38 = vadd.f32 %v382_v6, %v227_v35  ;;  %v243_v42 = vadd.f32 %v382_v6, %v228_v39 }
  0x16   : > { %vm244_vm0 = vcmp.ge.f32.partialorder %v236_v12, 0.0  ;;  %v252_v16 = vmul.f32 0.2, %v236_v12  ;;  %v253_v17 = vmul.f32 0.2, %v237_v13  ;;  %vm245_vm1 = vcmp.ge.f32.partialorder %v237_v13, 0.0 }
  0x17   : > { %v254_v22 = vmul.f32 0.2, %v238_v18  ;;  %vm246_vm2 = vcmp.ge.f32.partialorder %v238_v18, 0.0  ;;  %v255_v28 = vmul.f32 0.2, %v239_v23  ;;  %vm247_vm3 = vcmp.ge.f32.partialorder %v239_v23, 0.0 }
  0x18   : > { %v260_v19 = vsel %vm244_vm0, %v236_v12, %v252_v16  ;;  %v261_v21 = vsel %vm245_vm1, %v237_v13, %v253_v17  ;;  %v256_v33 = vmul.f32 0.2, %v240_v29  ;;  %vm248_vm4 = vcmp.ge.f32.partialorder %v240_v29, 0.0 }
  0x19   : > { %268 = vxpose.xlu0.b32.start [1/8] (short) (narrow) %v260_v19, 8  ;;  %v262_v27 = vsel %vm246_vm2, %v238_v18, %v254_v22  ;;  %v263_v32 = vsel %vm247_vm3, %v239_v23, %v255_v28  ;;  %v257_v37 = vmul.f32 0.2, %v241_v34  ;;  %vm249_vm5 = vcmp.ge.f32.partialorder %v241_v34, 0.0 }
  0x1a   : > { %v264_v36 = vsel %vm248_vm4, %v240_v29, %v256_v33  ;;  %v258_v41 = vmul.f32 0.2, %v242_v38  ;;  %vm250_vm6 = vcmp.ge.f32.partialorder %v242_v38, 0.0  ;;  %v259_v44 = vmul.f32 0.2, %v243_v42 }
  0x1b   : > { %v265_v40 = vsel %vm249_vm5, %v241_v34, %v257_v37  ;;  %vm251_vm7 = vcmp.ge.f32.partialorder %v243_v42, 0.0 }
  0x1c   : > { %v266_v43 = vsel %vm250_vm6, %v242_v38, %v258_v41  ;;  %v267_v45 = vsel %vm251_vm7, %v243_v42, %v259_v44 }
  0x1d   : > { %269 = vxpose.xlu0.b32.cont [2/8] (short) (narrow) %v261_v21, 8 }
  0x21   : > { %270 = vxpose.xlu0.b32.cont [3/8] (short) (narrow) %v262_v27, 8 }
  0x25   : > { %271 = vxpose.xlu0.b32.cont [4/8] (short) (narrow) %v263_v32, 8 }
  0x29   : > { %272 = vxpose.xlu0.b32.cont [5/8] (short) (narrow) %v264_v36, 8 }
  0x2d   : > { %273 = vxpose.xlu0.b32.cont [6/8] (short) (narrow) %v265_v40, 8 }
  0x31   : > { %274 = vxpose.xlu0.b32.cont [7/8] (short) (narrow) %v266_v43, 8 }
  0x35   : > { %275 = vxpose.xlu0.b32.end [8/8] (short) (narrow) %v267_v45, 8 }
  0x95   : > { %v284_v46 = vpop.trf.xlu0 }
  0x96   : > { %301 = vst.msk [vmem:[%s197_s28] sm:$0xff] %vm300_vm8, %v284_v46 }
  0x97 PF: > { %s13_s14 = sadd.s32 1, %s451_s14   ;;  %s521_s12 = smov %s447_s13 }
  0x98   : > { %p10_p6 = scmp.ge.s32.totalorder %s13_s14, 4   ;;  %s522_s13 = smov %s524_s15 }
  0x9a   :  { %12 = sbr.rel (!%p10_p6) target bundleno = 2 (0x2), region = 62 }

// kernel: downsample_conv.2
= control target key start
LH: loop header
LB: loop body
LE: loop exit
PB: predicated region body
PF: predicated region fallthrough
CT: control target
= control target key end

     0   :  { %s886_s15 = smov 0   ;;  %s888_s16 = smov 0   ;;  %s968_s0 = inlined_call_operand.vmem [shape: bf16[128,128], index: 0, kind: input, shape index: {}]   ;;  %s969_s1 = inlined_call_operand.vmem [shape: bf16[128,128], index: 1, kind: input, shape index: {}]   ;;  %s970_s2 = inlined_call_operand.vmem [shape: bf16[128,128], index: 2, kind: output, shape index: {0}]   ;;  %s971_s3 = inlined_call_operand.vmem [shape: f32[2,1,128], index: 3, kind: output, shape index: {1}]   ;;  %s972_s4 = inlined_call_operand.vmem [shape: f32[2,1,128], index: 4, kind: output, shape index: {2}]  }
   0x1   :  { %s890_s17 = smov 0  }
   0x2 LB: > { %s27_s18 = sadd.s32 1, %s855_s16  ;;  %p690_p0 = scmp.ge.s32.totalorder %s859_s17, 1  ;;  %s859_s17 = sphi %s890_s17, %s15_s17   ;;  %s855_s16 = sphi %s888_s16, %s974_s16   ;;  %s851_s15 = sphi %s886_s15, %s973_s15  }
   0x3   : > { %p29_p1 = scmp.ge.s32.totalorder %s27_s18, 2  ;;  %p196_p2 = scmp.lt.s32.totalorder %s859_s17, 3 }
   0x5   : > { %s976_s18 = smov (%p29_p1, %s27_s18), 0  ;;  %p197_p3 = pnand %p690_p0, %p196_p2 }
   0x6   : > { %s691_s21 = sshll.u32 (!%p197_p3), %s851_s15, 3  ;;  %s715_s14 = sshll.u32 (!%p197_p3), %s851_s15, 6 }
   0x7   : > { %200 = sbr.rel (%p197_p3) target bundleno = 274 (0x112), region = 28  ;;  %p237_p4 = scmp.lt.s32.totalorder (!%p197_p3), %s691_s21, 15 }
   0x8   : > { %p257_p5 = scmp.lt.s32.totalorder (!%p197_p3), %s851_s15, 1 }
   0xc   : > { %v825_v0 = vld [vmem:[%s969_s1 + $0x38] sm:$0xff]   ;;  %v826_v1 = vld [vmem:[%s969_s1 + $0x30] sm:$0xff]   ;;  %s978_s21 = smov (!%p237_p4, %s691_s21), 15  ;;  %v827_v2 = vld [vmem:[%s969_s1 + $0x28] sm:$0xff]   ;;  %v465_v12 = vlaneseq  ;;  %v475_v16 = vstv %s715_s14  ;;  %s980_s15 = smov (!%p257_p5, %s851_s15), 1 }
   0xd   : > { %761 = vmatprep.subr.bf16.mxu0 %v825_v0  ;;  %785 = vmatprep.subr.bf16.mxu1 %v825_v0  ;;  %s692_s26 = sshll.u32 %s978_s21, 2  ;;  %v828_v3 = vld [vmem:[%s969_s1 + $0x20] sm:$0xff]   ;;  %v829_v6 = vld [vmem:[%s969_s1 + $0x18] sm:$0xff]   ;;  %v830_v7 = vld [vmem:[%s969_s1 + $0x10] sm:$0xff]   ;;  %s259_s24 = scalar_lea.vmem %s971_s3, %s980_s15 }
   0xe   : > { %762 = vmatpush3.bf16.msra.mxu0 %v825_v0  ;;  %793 = vmatpush3.bf16.msra.mxu1 %v825_v0  ;;  %s924_s29 = scalar_lea.vmem %s968_s0, %s692_s26  ;;  %v831_v8 = vld [vmem:[%s969_s1 + $0x8] sm:$0xff]   ;;  %v832_v9 = vld [vmem:[%s969_s1] sm:$0xff]   ;;  %v466_v13 = vshrl.u32 %v465_v12, 7  ;;  %s255_s22 = scalar_lea.vmem %s970_s2, %s692_s26 }
   0xf   : > { %763 = vmatprep.subr.bf16.mxu0 %v826_v1  ;;  %786 = vmatprep.subr.bf16.mxu1 %v826_v1  ;;  %v833_v4 = vld [vmem:[%s924_s29] sm:$0xff]   ;;  %v835_v5 = vld [vmem:[%s924_s29 + $0x10] sm:$0xff]   ;;  %v834_v10 = vld [vmem:[%s924_s29 + $0x8] sm:$0xff]   ;;  %s262_s27 = scalar_lea.vmem %s972_s4, %s980_s15 }
  0x10   : > { %777 = vmatprep.mubr.bf16.mxu0 %v833_v4  ;;  %781 = vmatprep.mubr.bf16.mxu1 %v835_v5  ;;  %v836_v11 = vld [vmem:[%s924_s29 + $0x18] sm:$0xff]   ;;  %v468_v14 = vadd.s32 16, %v466_v13  ;;  %v467_v15 = vadd.s32 8, %v466_v13  ;;  %v476_v17 = vadd.s32 %v475_v16, %v466_v13  ;;  %v469_v18 = vadd.s32 24, %v466_v13 }
  0x11   : > { %v470_v22 = vadd.s32 32, %v466_v13  ;;  %v472_v25 = vadd.s32 48, %v466_v13  ;;  %v471_v28 = vadd.s32 40, %v466_v13  ;;  %v473_v35 = vadd.s32 56, %v466_v13 }
  0x12   : > { %764 = vmatpush3.bf16.msra.mxu0 %v826_v1  ;;  %794 = vmatpush3.bf16.msra.mxu1 %v826_v1  ;;  %v478_v20 = vadd.s32 %v475_v16, %v468_v14  ;;  %v477_v23 = vadd.s32 %v475_v16, %v467_v15  ;;  %vm484_vm0 = vcmp.lt.s32.totalorder %v476_v17, 128  ;;  %v479_v26 = vadd.s32 %v475_v16, %v469_v18 }
  0x13   : > { %765 = vmatprep.subr.bf16.mxu0 %v827_v2  ;;  %787 = vmatprep.subr.bf16.mxu1 %v827_v2  ;;  %v480_v30 = vadd.s32 %v475_v16, %v470_v22  ;;  %v482_v36 = vadd.s32 %v475_v16, %v472_v25  ;;  %v481_v39 = vadd.s32 %v475_v16, %v471_v28 }
  0x14   : > { %vm486_vm1 = vcmp.lt.s32.totalorder %v478_v20, 128  ;;  %vm485_vm2 = vcmp.lt.s32.totalorder %v477_v23, 128  ;;  %vm487_vm3 = vcmp.lt.s32.totalorder %v479_v26, 128  ;;  %v483_v48 = vadd.s32 %v475_v16, %v473_v35 }
  0x15   : > { %vm488_vm4 = vcmp.lt.s32.totalorder %v480_v30, 128  ;;  %vm489_vm5 = vcmp.lt.s32.totalorder %v481_v39, 128  ;;  %vm490_vm6 = vcmp.lt.s32.totalorder %v482_v36, 128 }
  0x16   : > { %766 = vmatpush3.bf16.msra.mxu0 %v827_v2  ;;  %795 = vmatpush3.bf16.msra.mxu1 %v827_v2  ;;  %vm491_vm7 = vcmp.lt.s32.totalorder %v483_v48, 128 }
  0x17   : > { %767 = vmatprep.subr.bf16.mxu0 %v828_v3  ;;  %788 = vmatprep.subr.bf16.mxu1 %v828_v3 }
  0x1a   : > { %768 = vmatpush3.bf16.msra.mxu0 %v828_v3  ;;  %796 = vmatpush3.bf16.msra.mxu1 %v828_v3 }
  0x1b   : > { %769 = vmatprep.subr.bf16.mxu0 %v829_v6  ;;  %789 = vmatprep.subr.bf16.mxu1 %v829_v6 }
  0x1e   : > { %770 = vmatpush3.bf16.msra.mxu0 %v829_v6  ;;  %797 = vmatpush3.bf16.msra.mxu1 %v829_v6 }
  0x1f   : > { %771 = vmatprep.subr.bf16.mxu0 %v830_v7  ;;  %790 = vmatprep.subr.bf16.mxu1 %v830_v7 }
  0x22   : > { %772 = vmatpush3.bf16.msra.mxu0 %v830_v7  ;;  %798 = vmatpush3.bf16.msra.mxu1 %v830_v7 }
  0x23   : > { %773 = vmatprep.subr.bf16.mxu0 %v831_v8  ;;  %791 = vmatprep.subr.bf16.mxu1 %v831_v8 }
  0x26   : > { %774 = vmatpush3.bf16.msra.mxu0 %v831_v8  ;;  %799 = vmatpush3.bf16.msra.mxu1 %v831_v8 }
  0x27   : > { %775 = vmatprep.subr.bf16.mxu0 %v832_v9  ;;  %792 = vmatprep.subr.bf16.mxu1 %v832_v9 }
  0x2a   : > { %776 = vmatpush3.bf16.msra.mxu0 %v832_v9  ;;  %800 = vmatpush3.bf16.msra.mxu1 %v832_v9 }
  0x2d   : > { %778 = vmatmul.mubr.bf16.vlgmr.msra.gmra.mxu0 %v834_v10  ;;  %782 = vmatmul.mubr.bf16.vlgmr.msra.gmra.mxu1 %v836_v11 }
  0xed   : > { %v779_v19 = vpop.f32.mrf.mxu0  ;;  %v783_v21 = vpop.f32.mrf.mxu1 }
  0xee   : > { %v510_v40 = vsel %vm486_vm1, %v779_v19, 0.0  ;;  %v514_v60 = vsel %vm490_vm6, %v783_v21, 0.0 }
  0xef   : > { %v394_v24 = vpop.f32.mrf.mxu0  ;;  %v410_v27 = vpop.f32.mrf.mxu1  ;;  %v532_v49 = vmul.f32 %v510_v40, %v510_v40  ;;  %v536_v1 = vmul.f32 %v514_v60, %v514_v60 }
  0xf0   : > { %v508_v32 = vsel %vm484_vm0, %v394_v24, 0.0  ;;  %v512_v52 = vsel %vm488_vm4, %v410_v27, 0.0 }
  0xf1   : > { %v780_v29 = vpop.f32.mrf.mxu0  ;;  %v784_v31 = vpop.f32.mrf.mxu1  ;;  %v530_v44 = vmul.f32 %v508_v32, %v508_v32  ;;  %v534_v57 = vmul.f32 %v512_v52, %v512_v52 }
  0xf2   : > { %v734_v33 = vpack.c.bf16 %v780_v29, %v779_v19  ;;  %v744_v34 = vpack.c.bf16 %v784_v31, %v783_v21  ;;  %v511_v47 = vsel %vm487_vm3, %v780_v29, 0.0  ;;  %v515_v0 = vsel %vm491_vm7, %v784_v31, 0.0 }
  0xf3   : > { %v397_v37 = vpop.f32.mrf.mxu0  ;;  %v413_v38 = vpop.f32.mrf.mxu1  ;;  %v533_v53 = vmul.f32 %v511_v47, %v511_v47  ;;  %v537_v4 = vmul.f32 %v515_v0, %v515_v0 }
  0xf4   : > { %746 = vst [vmem:[%s255_s22 + $0x8] sm:$0xff] %v734_v33   ;;  %v729_v41 = vpack.c.bf16 %v397_v37, %v394_v24  ;;  %v509_v42 = vsel %vm485_vm2, %v397_v37, 0.0  ;;  %748 = vst [vmem:[%s255_s22 + $0x18] sm:$0xff] %v744_v34   ;;  %v739_v43 = vpack.c.bf16 %v413_v38, %v410_v27  ;;  %v513_v56 = vsel %vm489_vm5, %v413_v38, 0.0 }
  0xf5   : > { %v516_v45 = vadd.f32 %v509_v42, %v508_v32  ;;  %v531_v46 = vmul.f32 %v509_v42, %v509_v42  ;;  %v535_v62 = vmul.f32 %v513_v56, %v513_v56 }
  0xf6   : > { %730 = vst [vmem:[%s255_s22] sm:$0xff] %v729_v41   ;;  %747 = vst [vmem:[%s255_s22 + $0x10] sm:$0xff] %v739_v43  }
  0xf7   : > { %v517_v50 = vadd.f32 %v516_v45, %v510_v40  ;;  %v538_v51 = vadd.f32 %v531_v46, %v530_v44 }
  0xf9   : > { %v539_v54 = vadd.f32 %v538_v51, %v532_v49  ;;  %v518_v55 = vadd.f32 %v517_v50, %v511_v47 }
  0xfb   : > { %v519_v58 = vadd.f32 %v518_v55, %v512_v52  ;;  %v540_v59 = vadd.f32 %v539_v54, %v533_v53 }
  0xfd   : > { %v520_v61 = vadd.f32 %v519_v58, %v513_v56  ;;  %v541_v63 = vadd.f32 %v540_v59, %v534_v57 }
  0xff   : > { %v521_v2 = vadd.f32 %v520_v61, %v514_v60  ;;  %v542_v3 = vadd.f32 %v541_v63, %v535_v62 }
 0x101   : > { %v522_v5 = vadd.f32 %v521_v2, %v515_v0  ;;  %v543_v6 = vadd.f32 %v542_v3, %v536_v1 }
 0x103   : > { %v523_v7 = vrot.slane %v522_v5, 4  ;;  %v544_v8 = vadd.f32 %v543_v6, %v537_v4 }
 0x105   : > { %v524_v9 = vadd.f32 %v523_v7, %v522_v5  ;;  %v545_v10 = vrot.slane %v544_v8, 4 }
 0x107   : > { %v525_v11 = vrot.slane %v524_v9, 2  ;;  %v546_v12 = vadd.f32 %v545_v10, %v544_v8 }
 0x109   : > { %v526_v13 = vadd.f32 %v525_v11, %v524_v9  ;;  %v547_v14 = vrot.slane %v546_v12, 2 }
 0x10b   : > { %v527_v15 = vrot.slane %v526_v13, 1  ;;  %v548_v16 = vadd.f32 %v547_v14, %v546_v12 }
 0x10d   : > { %v528_v17 = vadd.f32 %v527_v15, %v526_v13  ;;  %v549_v18 = vrot.slane %v548_v16, 1 }
 0x10f   : > { %529 = vst [vmem:[%s259_s24] sm:$0x1] %v528_v17  ;;  %v550_v19 = vadd.f32 %v549_v18, %v548_v16 }
 0x111   : > { %551 = vst [vmem:[%s262_s27] sm:$0x1] %v550_v19 }
 0x112 PF: > { %s15_s17 = sadd.s32 1, %s859_s17   ;;  %s973_s15 = smov %s855_s16 }
 0x113   : > { %p12_p6 = scmp.ge.s32.totalorder %s15_s17, 4   ;;  %s974_s16 = smov %s976_s18 }
 0x115   :  { %14 = sbr.rel (!%p12_p6) target bundleno = 2 (0x2), region = 85 }

</bundles_post_ra>
